<compile_context>
chip_gen: v7x
topology: tpu7x:2x2x1
jax: 0.10.0
libtpu: 0.0.40
codegen_flags: <defaults>
</compile_context>

<pallas_src>
import functools

import jax
import jax.numpy as jnp
from jax.experimental import pallas as pl
from jax.experimental.pallas import tpu as pltpu


def gated_conv_stats_kernel(patch_ref, w_ref, bias_ref, gated_ref, stats_ref,
                            *, cout, neg_slope):
    # patch_ref : (1, Ktot, TM)      bf16  channel-major im2col slab for this tile
    # w_ref     : (2*Cout, Ktot)     bf16  fused [conv | mask_conv] weights
    # bias_ref  : (2*Cout, 1)        f32   fused biases
    # gated_ref : (1, Cout, TM)      f32   activation(x) * sigmoid(mask)
    # stats_ref : (1, 1, 2*Cout, 1)  f32   per-tile [channel sums ; channel sum-of-squares]
    acc = jnp.dot(w_ref[...], patch_ref[0],
                  preferred_element_type=jnp.float32)          # (2*Cout, TM) f32, one MXU matmul
    acc = acc + bias_ref[...]                                  # lane broadcast
    x = acc[:cout, :]                                          # conv2d(input)
    m = acc[cout:, :]                                          # mask_conv2d(input)
    x = jnp.where(x >= 0, x, neg_slope * x)                    # LeakyReLU(0.2)
    g = x * jax.nn.sigmoid(m)                                  # gated activation
    gated_ref[0] = g

    # One-pass partial BatchNorm statistics for this tile (lane reduction on the XLU).
    both = jnp.concatenate([g, g * g], axis=0)                 # (2*Cout, TM)
    stats_ref[0, 0] = jnp.sum(both, axis=1, keepdims=True)     # (2*Cout, 1)


def bn_affine_kernel(gated_ref, ss_ref, out_ref):
    # gated_ref: (1, Cout, TM) f32 ; ss_ref: (2, Cout, 1) f32  (row 0 = scale, row 1 = shift)
    out_ref[0] = gated_ref[0] * ss_ref[0] + ss_ref[1]


def gated_conv2d_with_activation(x_nchw, wx, wm, bx, bm, gamma, beta,
                                 *, stride=1, padding=1, neg_slope=0.2, eps=1e-5):
    """Forward pass matching GatedConv2dWithActivation (batch_norm=True, LeakyReLU(0.2))."""
    # TODO(synk): stride != 1, dilation != 1 and groups != 1 are not implemented.
    assert stride == 1, "only stride=1 implemented"
    N, Cin, H, W = x_nchw.shape
    Cout, _, KH, KW = wx.shape
    Ho = H + 2 * padding - KH + 1
    Wo = W + 2 * padding - KW + 1
    HoWo = Ho * Wo
    Ktot = Cin * KH * KW
    Mtot = N * HoWo

    # Spatial tile: largest multiple of 128 that divides Ho*Wo, capped at 512 so the
    # double-buffered per-tile working set stays comfortably inside v7x's smaller VMEM.
    if HoWo % 128 == 0:
        TM = 128
        while TM * 2 <= min(HoWo, 512) and HoWo % (TM * 2) == 0:
            TM *= 2
    else:
        TM = HoWo                      # full-extent block fallback for small odd shapes
    nS = HoWo // TM

    # ---- Host prep (XLA, runs once): spatial zero-pad, channel-major im2col, fused weights.
    # TODO(synk): for large shapes, move the im2col/halo handling into the kernel via the
    # index_map instead of materializing the (N, Ktot, HoWo) slab in HBM.
    xpad = jnp.pad(x_nchw.astype(jnp.float32),
                   ((0, 0), (0, 0), (padding, padding), (padding, padding)))
    taps = [xpad[:, :, kh:kh + Ho, kw:kw + Wo]                  # each (N, Cin, Ho, Wo)
            for kh in range(KH) for kw in range(KW)]
    patches = (jnp.stack(taps, axis=2)                          # (N, Cin, KH*KW, Ho, Wo)
               .reshape(N, Ktot, HoWo)
               .astype(jnp.bfloat16))

    wf = (jnp.concatenate([wx, wm], axis=0)                     # (2*Cout, Cin, KH, KW)
          .reshape(2 * Cout, Ktot)
          .astype(jnp.bfloat16))
    bias = jnp.concatenate([bx, bm], axis=0).reshape(2 * Cout, 1).astype(jnp.float32)

    parallel2 = pltpu.CompilerParams(dimension_semantics=("parallel", "parallel"))

    # ---- Pass 1: fused conv + gate, per-tile partial BN statistics.
    kernel1 = functools.partial(gated_conv_stats_kernel, cout=Cout, neg_slope=neg_slope)
    gated, stats = pl.pallas_call(
        kernel1,
        grid=(N, nS),
        in_specs=[
            pl.BlockSpec((1, Ktot, TM), lambda n, s: (n, 0, s)),
            pl.BlockSpec((2 * Cout, Ktot), lambda n, s: (0, 0)),
            pl.BlockSpec((2 * Cout, 1), lambda n, s: (0, 0)),
        ],
        out_specs=[
            pl.BlockSpec((1, Cout, TM), lambda n, s: (n, 0, s)),
            pl.BlockSpec((1, 1, 2 * Cout, 1), lambda n, s: (n, s, 0, 0)),
        ],
        out_shape=[
            jax.ShapeDtypeStruct((N, Cout, HoWo), jnp.float32),
            jax.ShapeDtypeStruct((N, nS, 2 * Cout, 1), jnp.float32),
        ],
        compiler_params=parallel2,
    )(patches, wf, bias)

    # ---- Finalize GLOBAL BatchNorm statistics (tiny O(N*nS*Cout) reduction).
    # NOTE: one-pass E[x^2] - E[x]^2 in f32; fine at these magnitudes (review caveat noted).
    totals = jnp.sum(stats[..., 0], axis=(0, 1))                # (2*Cout,)
    mean = totals[:Cout] / Mtot
    var = jnp.maximum(totals[Cout:] / Mtot - mean * mean, 0.0)
    inv_std = jax.lax.rsqrt(var + eps)
    scale = gamma.astype(jnp.float32) * inv_std
    shift = beta.astype(jnp.float32) - mean * scale
    ss = jnp.stack([scale, shift], axis=0).reshape(2, Cout, 1)

    # ---- Pass 2: apply the BN affine, lane-dense channel-major tiles -> NCHW output.
    out_flat = pl.pallas_call(
        bn_affine_kernel,
        grid=(N, nS),
        in_specs=[
            pl.BlockSpec((1, Cout, TM), lambda n, s: (n, 0, s)),
            pl.BlockSpec((2, Cout, 1), lambda n, s: (0, 0, 0)),
        ],
        out_specs=pl.BlockSpec((1, Cout, TM), lambda n, s: (n, 0, s)),
        out_shape=jax.ShapeDtypeStruct((N, Cout, HoWo), jnp.float32),
        compiler_params=parallel2,
    )(gated, ss)

    return out_flat.reshape(N, Cout, Ho, Wo)      # already NCHW; no final transpose


def _reference_forward(x, wx, wm, bx, bm, gamma, beta, padding, neg_slope, eps):
    """Pure-JAX f32 reference (lax conv) for the correctness check."""
    dn = ("NCHW", "OIHW", "NCHW")

    def conv(w, b):
        y = jax.lax.conv_general_dilated(
            x, w, window_strides=(1, 1),
            padding=[(padding, padding), (padding, padding)],
            dimension_numbers=dn)
        return y + b.reshape(1, -1, 1, 1)

    xc = conv(wx, bx)
    mc = conv(wm, bm)
    a = jnp.where(xc >= 0, xc, neg_slope * xc) * jax.nn.sigmoid(mc)
    mean = a.mean(axis=(0, 2, 3), keepdims=True)
    var = jnp.square(a - mean).mean(axis=(0, 2, 3), keepdims=True)
    return ((a - mean) * jax.lax.rsqrt(var + eps)
            * gamma.reshape(1, -1, 1, 1) + beta.reshape(1, -1, 1, 1))


if __name__ == "__main__":
    # Small shapes consistent with the module: Conv2d(4 -> 8, k=3, stride=1, padding=1)
    N, Cin, Cout, H, W, KH, KW, PAD = 2, 4, 8, 16, 16, 3, 3, 1

    key = jax.random.PRNGKey(0)
    k_x, k_wx, k_wm, k_bx, k_bm = jax.random.split(key, 5)

    x = jax.random.normal(k_x, (N, Cin, H, W), jnp.float32)

    # Deterministic parameter init mirroring the module's __init__:
    #   conv weights: kaiming_normal_  (std = sqrt(2 / fan_in), fan_in = Cin*KH*KW)
    #   conv biases : default Conv2d uniform(-1/sqrt(fan_in), 1/sqrt(fan_in))
    #   batch norm  : gamma = 1, beta = 0
    fan_in = Cin * KH * KW
    w_std = (2.0 / fan_in) ** 0.5
    b_bound = 1.0 / (fan_in ** 0.5)
    wx = jax.random.normal(k_wx, (Cout, Cin, KH, KW), jnp.float32) * w_std
    wm = jax.random.normal(k_wm, (Cout, Cin, KH, KW), jnp.float32) * w_std
    bx = jax.random.uniform(k_bx, (Cout,), jnp.float32, -b_bound, b_bound)
    bm = jax.random.uniform(k_bm, (Cout,), jnp.float32, -b_bound, b_bound)
    gamma = jnp.ones((Cout,), jnp.float32)
    beta = jnp.zeros((Cout,), jnp.float32)

    out = gated_conv2d_with_activation(x, wx, wm, bx, bm, gamma, beta,
                                       stride=1, padding=PAD)
    out = jax.block_until_ready(out)

    ref = _reference_forward(x, wx, wm, bx, bm, gamma, beta,
                             padding=PAD, neg_slope=0.2, eps=1e-5)
    ref = jax.block_until_ready(ref)

    assert out.shape == (N, Cout, H, W), out.shape
    # bf16 MXU operands (f32 accumulation) vs. an f32 reference -> loosened tolerance,
    # as recommended in the performance review.
    max_err = float(jnp.max(jnp.abs(out - ref)))
    assert jnp.allclose(out, ref, atol=5e-2, rtol=5e-2), max_err

    print("KERNEL_OK")
</pallas_src>

<mosaic_0001>
module attributes {stable_mosaic.version = 11 : i64} {
  func.func @gated_conv_stats_kernel(%arg0: i32, %arg1: i32, %arg2: memref<1x36x256xbf16, #tpu.memory_space<vmem>>, %arg3: memref<16x36xbf16, #tpu.memory_space<vmem>>, %arg4: memref<16x1xf32, #tpu.memory_space<vmem>>, %arg5: memref<1x8x256xf32, #tpu.memory_space<vmem>>, %arg6: memref<1x1x16x1xf32, #tpu.memory_space<vmem>>) attributes {dimension_semantics = [#tpu.dimension_semantics<parallel>, #tpu.dimension_semantics<parallel>], iteration_bounds = array<i64: 2, 1>, scalar_prefetch = 0 : i64, scratch_operands = 0 : i64, tpu.core_type = #tpu.core_type<tc>, window_params = [{transform_indices = @transform_0, window_bounds = array<i64: 1, 36, 256>}, {pipeline_mode = #tpu.pipeline_mode<synchronous>, transform_indices = @transform_1, window_bounds = array<i64: 16, 36>}, {pipeline_mode = #tpu.pipeline_mode<synchronous>, transform_indices = @transform_2, window_bounds = array<i64: 16, 1>}, {transform_indices = @transform_3, window_bounds = array<i64: 1, 8, 256>}, {transform_indices = @transform_4, window_bounds = array<i64: 1, 1, 16, 1>}]} {
    %c0 = arith.constant 0 : index
    %c0_0 = arith.constant 0 : index
    %0 = vector.load %arg3[%c0, %c0_0] : memref<16x36xbf16, #tpu.memory_space<vmem>>, vector<16x36xbf16>
    %c0_1 = arith.constant 0 : index
    %c0_2 = arith.constant 0 : index
    %c0_3 = arith.constant 0 : index
    %1 = vector.load %arg2[%c0_1, %c0_2, %c0_3] : memref<1x36x256xbf16, #tpu.memory_space<vmem>>, vector<1x36x256xbf16>
    %2 = vector.shape_cast %1 : vector<1x36x256xbf16> to vector<36x256xbf16>
    %cst = arith.constant dense<0.000000e+00> : vector<16x256xf32>
    %3 = tpu.matmul %0, %2, %cst {dimension_numbers = #tpu.dot_dimension_numbers<[1], [0], [0], [1], [0, 0, 1, 1], [], []>} : vector<16x36xbf16>, vector<36x256xbf16>, vector<16x256xf32> -> vector<16x256xf32>
    %c0_4 = arith.constant 0 : index
    %c0_5 = arith.constant 0 : index
    %4 = vector.load %arg4[%c0_4, %c0_5] : memref<16x1xf32, #tpu.memory_space<vmem>>, vector<16x1xf32>
    %5 = vector.broadcast %4 : vector<16x1xf32> to vector<16x256xf32>
    %6 = arith.addf %3, %5 : vector<16x256xf32>
    %7 = vector.extract_strided_slice %6 {offsets = [0, 0], sizes = [8, 256], strides = [1, 1]} : vector<16x256xf32> to vector<8x256xf32>
    %8 = vector.extract_strided_slice %6 {offsets = [8, 0], sizes = [8, 256], strides = [1, 1]} : vector<16x256xf32> to vector<8x256xf32>
    %cst_6 = arith.constant 0.000000e+00 : f32
    %9 = vector.broadcast %cst_6 : f32 to vector<8x256xf32>
    %10 = arith.cmpf oge, %7, %9 : vector<8x256xf32>
    %cst_7 = arith.constant 2.000000e-01 : f32
    %11 = vector.broadcast %cst_7 : f32 to vector<8x256xf32>
    %12 = arith.mulf %11, %7 : vector<8x256xf32>
    %13 = arith.select %10, %7, %12 : vector<8x256xi1>, vector<8x256xf32>
    %14 = arith.negf %8 : vector<8x256xf32>
    %15 = math.exp %14 : vector<8x256xf32>
    %cst_8 = arith.constant 1.000000e+00 : f32
    %16 = vector.broadcast %cst_8 : f32 to vector<8x256xf32>
    %17 = arith.addf %16, %15 : vector<8x256xf32>
    %18 = arith.divf %16, %17 : vector<8x256xf32>
    %19 = arith.mulf %13, %18 : vector<8x256xf32>
    %c0_9 = arith.constant 0 : index
    %c0_10 = arith.constant 0 : index
    %c0_11 = arith.constant 0 : index
    %20 = vector.load %arg5[%c0_9, %c0_10, %c0_11] : memref<1x8x256xf32, #tpu.memory_space<vmem>>, vector<1x8x256xf32>
    %21 = vector.shape_cast %20 : vector<1x8x256xf32> to vector<8x256xf32>
    %22 = vector.shape_cast %19 : vector<8x256xf32> to vector<1x8x256xf32>
    tpu.vector_store %arg5[%c0_9, %c0_10, %c0_11], %22 {strides = array<i32>} : memref<1x8x256xf32, #tpu.memory_space<vmem>>, vector<1x8x256xf32>,
    %23 = arith.mulf %19, %19 : vector<8x256xf32>
    %24 = tpu.concatenate %19, %23 in 0 : vector<8x256xf32>, vector<8x256xf32> -> vector<16x256xf32>
    %cst_12 = arith.constant dense<0.000000e+00> : vector<16xf32>
    %25 = vector.multi_reduction <add>, %24, %cst_12 [1] : vector<16x256xf32> to vector<16xf32>
    %26 = vector.shape_cast %25 : vector<16xf32> to vector<16x1xf32>
    %c0_13 = arith.constant 0 : index
    %c0_14 = arith.constant 0 : index
    %c0_15 = arith.constant 0 : index
    %c0_16 = arith.constant 0 : index
    %27 = vector.load %arg6[%c0_13, %c0_14, %c0_15, %c0_16] : memref<1x1x16x1xf32, #tpu.memory_space<vmem>>, vector<1x1x16x1xf32>
    %28 = vector.shape_cast %27 : vector<1x1x16x1xf32> to vector<16x1xf32>
    %29 = vector.shape_cast %26 : vector<16x1xf32> to vector<1x1x16x1xf32>
    tpu.vector_store %arg6[%c0_13, %c0_14, %c0_15, %c0_16], %29 {strides = array<i32>} : memref<1x1x16x1xf32, #tpu.memory_space<vmem>>, vector<1x1x16x1xf32>,
    return
  }
  func.func @transform_0(%arg0: i32, %arg1: i32) -> (i32, i32, i32) {
    %c0_i32 = arith.constant 0 : i32
    %c0_i32_0 = arith.constant 0 : i32
    return %arg0, %c0_i32, %arg1 : i32, i32, i32
  }
  func.func @transform_1(%arg0: i32, %arg1: i32) -> (i32, i32) {
    %c0_i32 = arith.constant 0 : i32
    %c0_i32_0 = arith.constant 0 : i32
    %c0_i32_1 = arith.constant 0 : i32
    return %c0_i32, %c0_i32_0 : i32, i32
  }
  func.func @transform_2(%arg0: i32, %arg1: i32) -> (i32, i32) {
    %c0_i32 = arith.constant 0 : i32
    %c0_i32_0 = arith.constant 0 : i32
    %c0_i32_1 = arith.constant 0 : i32
    return %c0_i32, %c0_i32_0 : i32, i32
  }
  func.func @transform_3(%arg0: i32, %arg1: i32) -> (i32, i32, i32) {
    %c0_i32 = arith.constant 0 : i32
    %c0_i32_0 = arith.constant 0 : i32
    return %arg0, %c0_i32, %arg1 : i32, i32, i32
  }
  func.func @transform_4(%arg0: i32, %arg1: i32) -> (i32, i32, i32, i32) {
    %c0_i32 = arith.constant 0 : i32
    %c0_i32_0 = arith.constant 0 : i32
    %c0_i32_1 = arith.constant 0 : i32
    return %arg0, %arg1, %c0_i32, %c0_i32_0 : i32, i32, i32, i32
  }
}

</mosaic_0001>

<bundles_post_ra>
// kernel: tpu_custom_call.1
= control target key start
LH: loop header
LB: loop body
LE: loop exit
PB: predicated region body
PF: predicated region fallthrough
CT: control target
= control target key end

     0   :  { %10 = vsyncpa [#allocation3], 0  ;;  %s864_s0 = inlined_call_operand.vmem [shape: bf16[2,36,256], index: 0, kind: input, shape index: {}]   ;;  %s865_s1 = inlined_call_operand.vmem [shape: bf16[16,36], index: 1, kind: input, shape index: {}]   ;;  %s866_s2 = inlined_call_operand.vmem [shape: f32[16,1], index: 2, kind: input, shape index: {}]   ;;  %s867_s3 = inlined_call_operand.hbm [shape: f32[2,8,256], index: 3, kind: output, shape index: {0}]   ;;  %s868_s4 = inlined_call_operand.vmem [shape: f32[2,1,16,1], index: 4, kind: output, shape index: {1}]  }
   0x1   :  { %12 = vsyncpa [#allocation3 + $0x1], 0  ;;  %s742_s15 = smov 0   ;;  %s744_s16 = smov 0  }
   0x2   :  { %s746_s17 = smov 0   ;;  %s748_s18 = smov 0  }
   0x3   :  { %s750_s19 = smov 0   ;;  %s752_s20 = smov 0  }
   0x4 LB: > { %s533_s21 = sadd.s32 4294967295, %s713_s20   ;;  %s534_s22 = sadd.s32 4294967294, %s713_s20   ;;  %s713_s20 = sphi %s752_s20, %s18_s20   ;;  %s709_s19 = sphi %s750_s19, %s875_s19   ;;  %s705_s18 = sphi %s748_s18, %s874_s18   ;;  %s701_s17 = sphi %s746_s17, %s873_s17   ;;  %s697_s16 = sphi %s744_s16, %s872_s16   ;;  %s693_s15 = sphi %s742_s15, %s871_s15  }
   0x5   : > { %s30_s23 = sadd.s32 1, %s709_s19  ;;  %s109_s24 = sadd.s32 1, %s701_s17 }
   0x6   : > { %p32_p0 = scmp.ge.s32.totalorder %s30_s23, 2  ;;  %p119_p1 = scmp.ne.s32.totalorder %s701_s17, %s697_s16 }
   0x7   : > { %p120_p2 = scmp.eq.s32.totalorder %s533_s21, 1  ;;  %p125_p3 = scmp.ne.s32.totalorder %s697_s16, %s693_s15 }
   0x8   : > { %s877_s23 = smov (%p32_p0, %s30_s23), 0  ;;  %p126_p5 = scmp.eq.s32.totalorder %s534_s22, 1 }
   0x9   : > { %p782_p4 = por %p120_p2, %p119_p1  ;;  %s104_s26 = ssub.s32 %s709_s19, %s877_s23 }
   0xa   : > { %p537_p6 = scmp.ge.s32.totalorder %s713_s20, 1  ;;  %p107_p7 = scmp.eq.s32.totalorder %s104_s26, 0 }
   0xb   : > { %p789_p8 = por %p126_p5, %p125_p3  ;;  %p191_p9 = scmp.lt.s32.totalorder %s713_s20, 3 }
   0xc   : > { %s795_s28 = scalar_select %p107_p7, %s701_s17, %s109_s24  }
   0xd   : > { %p192_p10 = pnand %p537_p6, %p191_p9 }
   0xe   : > { %p231_p11 = scmp.lt.s32.totalorder (!%p192_p10), %s705_s18, 1  ;;  %v715_v0 = vmov (!%p192_p10), 0   ;;  %v259_v1 = vld [vmem:[%s866_s2 + $0x8] sm:$0xff] (!%p192_p10)  ;;  %v258_v2 = vld [vmem:[%s866_s2] sm:$0xff] (!%p192_p10)  ;;  %vm304_vm0 = vcmask (!%p192_p10), 1041408   ;;  %vm300_vm1 = vcmask (!%p192_p10), 293888  }
   0xf   : > { %195 = sbr.rel (%p192_p10) target bundleno = 434 (0x1b2), region = 32  ;;  %343 = vmatprep.mubr.bf16.mxu0 (!%p192_p10), %v715_v0  ;;  %617 = vset.pattern.permute.xlu0 (!%p192_p10), %v715_v0  ;;  %v626_v11 = vld [vmem:[%s865_s1] sm:$0xff] (!%p192_p10)   ;;  %s216_s14 = sand.u32 (!%p192_p10), 1, %s697_s16  }
  0x10   : > { %267 = vperm.xlu0 (!%p192_p10), %617, %v259_v1   ;;  %s538_s21 = sshll.u32 (!%p192_p10), %s216_s14, 4  ;;  %s559_s24 = sshll.u32 (!%p192_p10), %s705_s18, 8 }
  0x11   : > { %s218_s22 = scalar_lea.vmem (!%p192_p10), [#allocation2], %s538_s21  ;;  %s819_s6 = scalar_lea.hbm (!%p192_p10), %s867_s3, %s559_s24 }
  0x12   : > { %s413_s26 = sshll.u32 (!%p192_p10), %s218_s22, 4  ;;  %s388_s7 = scalar_lea.sflag (!%p192_p10), [#allocation3], %s216_s14  ;;  %s414_s26 = int_to_ptr.vmem [resolvable:$true] %s413_s26 }
  0x13   : > { %s716_s9 = smov (!%p192_p10), [#allocation2]  }
  0x14   : > { %262 = vperm.xlu0 (!%p192_p10), %617, %v258_v2   ;;  %s639_s10 = sshll.u32 (!%p192_p10), %s716_s9, 4  ;;  %s640_s10 = int_to_ptr.vmem [resolvable:$false] %s639_s10 }
  0x15   : > { %p642_p1 = scmp.lt.s32.totalorder (!%p192_p10), %s414_s26, %s640_s10 }
  0x16   : > { %s802_s5 = scalar_select %p231_p11, %s705_s18, 1 }
  0x18   : > { %s560_s8 = smul.u32 40, %s802_s5 }
  0x1a   : > { %s238_s11 = scalar_lea.vmem %s864_s0, %s560_s8  ;;  %s635_s8 = scalar_lea.vmem %s414_s26, 256 }
  0x1b   : > { %v618_v3 = vld [vmem:[%s238_s11 + $0x4] ss:$8 sps:$4 sm:$0xff]   ;;  %v620_v4 = vld [vmem:[%s238_s11] ss:$8 sps:$4 sm:$0xff]   ;;  %v621_v5 = vld [vmem:[%s238_s11 + $0x14] ss:$8 sps:$4 sm:$0xff]   ;;  %p636_p12 = scmp.ne.s32.totalorder %s414_s26, %s635_s8 }
  0x1c   : > { %311 = vmatprep.subr.bf16.mxu0 %v618_v3  ;;  %v257_v6 = vld [vmem:[%s238_s11 + $0x20] sm:$0x33]  ;;  %v623_v7 = vld [vmem:[%s238_s11 + $0x10] ss:$8 sps:$4 sm:$0xff]   ;;  %s641_s11 = scalar_lea.vmem %s640_s10, 512 }
  0x1d   : > { %312 = vmatpush1.bf16.msra.mxu0 %v620_v4  ;;  %v548_v8 = vcombine.high %v257_v6, %v257_v6  ;;  %v547_v9 = vcombine.low %v257_v6, %v257_v6  ;;  %p637_p13 = pnand %p636_p12, %p782_p4  ;;  %p643_p2 = scmp.lt.s32.totalorder %s641_s11, %s635_s8 }
  0x1e   : > { %313 = vmatprep.subr.bf16.mxu0 %v621_v5 }
  0x1f   : > { %v306_v10 = vsel %vm304_vm0, %v547_v9, 0  ;;  %p638_p0 = pneg %p637_p13  ;;  %p644_p3 = por %p643_p2, %p642_p1 }
  0x21   : > { %314 = vmatpush1.bf16.msra.mxu0 %v623_v7  ;;  %p645_p5 = pnand %p644_p3, %p638_p0 }
  0x22   : > { %549 = vmatprep.subr.msk.bf16.mxu0 %vm304_vm0, %v548_v8 }
  0x25   : > { %316 = vmatpush1.bf16.msra.mxu0 %v306_v10 }
  0x28   : > { %550 = vmatmul.mubr.msk.bf16.vlgmr.msra.gmra.mrb[0].mxu0 %vm300_vm1, %v626_v11 }
  0x8f   : > { %v268_v14 = vpop.permute.xlu0 %267 }
  0x93   : > { %v263_v24 = vpop.permute.xlu0 %262 }
  0xfb   : > { %v345_v12 = vpop.f32.mrb[0].mxu0 }
  0xfc   : > { %v347_v13 = vpop.f32.mrb[1].mxu0  ;;  %v346_v26 = vadd.f32 %v345_v12, %v263_v24 }
  0xfd   : > { %v349_v15 = vpop.f32.mrb[2].mxu0  ;;  %v348_v27 = vadd.f32 %v347_v13, %v263_v24 }
  0xfe   : > { %v350_v16 = vadd.f32 %v349_v15, %v268_v14  ;;  %v351_v17 = vpop.f32.mrb[3].mxu0  ;;  %v356_v28 = vmul.f32 0.2, %v346_v26  ;;  %vm354_vm2 = vcmp.ge.f32.partialorder %v346_v26, 0.0 }
  0xff   : > { %v352_v18 = vadd.f32 %v351_v17, %v268_v14  ;;  %v357_v29 = vmul.f32 0.2, %v348_v27  ;;  %vm355_vm3 = vcmp.ge.f32.partialorder %v348_v27, 0.0 }
 0x100   : > { %v551_v19 = vmul.f32 -1.442695, %v350_v16  ;;  %v358_v31 = vsel %vm354_vm2, %v346_v26, %v356_v28 }
 0x101   : > { %v552_v20 = vmul.f32 -1.442695, %v352_v18  ;;  %v359_v33 = vsel %vm355_vm3, %v348_v27, %v357_v29 }
 0x102   : > { %627 = vpow2.f32 %v551_v19 }
 0x103   : > { %629 = vpow2.f32 %v552_v20 }
 0x10c   : > { %v628_v21 = vpop.eup %627 }
 0x10d   : > { %v630_v22 = vpop.eup %629  ;;  %v366_v23 = vadd.f32 1.0, %v628_v21 }
 0x10e   : > { %v367_v25 = vadd.f32 1.0, %v630_v22 }
 0x10f   : > { %631 = vrcp.f32 %v366_v23 }
 0x110   : > { %633 = vrcp.f32 %v367_v25 }
 0x119   : > { %v632_v30 = vpop.eup %631 }
 0x11a   : > { %v634_v32 = vpop.eup %633  ;;  %v372_v34 = vmul.f32 %v632_v30, %v358_v31 }
 0x11b   : > { %v373_v35 = vmul.f32 %v634_v32, %v359_v33 }
 0x11c   : > { %v376_v36 = vmul.f32 %v372_v34, %v372_v34  ;;  %374 = vst [vmem:[%s218_s22] sm:$0xff] %v372_v34 }
 0x11d   : > { %v378_v37 = vadd.f32 %v373_v35, %v372_v34  ;;  %v377_v38 = vmul.f32 %v373_v35, %v373_v35  ;;  %375 = vst [vmem:[%s218_s22 + $0x8] sm:$0xff] %v373_v35 }
 0x11f   : > { %379 = vadd.xlane.f32.xlu1 %v378_v37  ;;  %v381_v39 = vadd.f32 %v377_v38, %v376_v36 }
 0x123   : > { %382 = vadd.xlane.f32.xlu1 %v381_v39 }
 0x124   : > { %648 = shalt.err (!%p645_p5)
}
 0x125   : > { %s649_s18 = scalar_lea.hbm %s819_s6, 256  ;;  %s653_s14 = scalar_lea.hbm %s867_s3, 512 }
 0x126   : > { %p650_p6 = scmp.ne.s32.totalorder %s819_s6, %s649_s18  ;;  %p654_p10 = scmp.lt.u32.totalorder %s819_s6, %s867_s3 }
 0x127   : > { %p655_p11 = scmp.lt.u32.totalorder %s653_s14, %s649_s18  ;;  %p657_p13 = scmp.lt.u32.totalorder %s649_s18, %s819_s6 }
 0x128   : > { %p651_p7 = pnand %p650_p6, %p782_p4 }
 0x129   : > { %p656_p12 = por %p655_p11, %p654_p10 }
 0x12a   : > { %p652_p9 = pneg %p651_p7 }
 0x12b   : > { %p658_p0 = por %p657_p13, %p656_p12 }
 0x12d   : > { %p659_p1 = pnand %p658_p0, %p652_p9 }
 0x12f   : > { %662 = shalt.err (!%p659_p1)
}
 0x130   : > { %561 = dma.vmem_to_hbm [thread:$0]  (%p782_p4), %s414_s26, 256, %s819_s6, %s388_s7   ;;  %vm384_vm4 = vcmask 7168  }
 0x131   : > { %s558_s24 = sshll.u32 %s802_s5, 4 }
 0x132   : > { %s249_s8 = scalar_lea.vmem %s868_s4, %s558_s24 }
 0x1ac   : > { %v380_v40 = vpop.xlane.xlu1 %379 }
 0x1ad   : > { %385 = vst.msk [vmem:[%s249_s8] sm:$0xff] %vm384_vm4, %v380_v40 }
 0x1b0   : > { %v383_v41 = vpop.xlane.xlu1 %382 }
 0x1b1   : > { %386 = vst.msk [vmem:[%s249_s8 + $0x8] sm:$0xff] %vm384_vm4, %v383_v41 }
 0x1b2 PF: > { %p567_p2 = scmp.ge.s32.totalorder %s713_s20, 2  ;;  %s428_s9 = sand.u32 1, %s693_s15  }
 0x1b3   : > { %s429_s25 = scalar_lea.sflag [#allocation3], %s428_s9 }
 0x1b4   : > { %p564_p3 = pnand %p567_p2, %p789_p8 }
 0x1b6   : > { %688 = dma.done.wait (!%p564_p3), %s429_s25, 256  }
 0x1b7   : > { %690 = vsyncadd (!%p564_p3), %s429_s25, 4294967040  ;;  %s18_s20 = sadd.s32 1, %s713_s20   ;;  %s871_s15 = smov %s697_s16 }
 0x1b8   : > { %p15_p4 = scmp.ge.s32.totalorder %s18_s20, 4   ;;  %s872_s16 = smov %s701_s17 }
 0x1b9   : > { %s873_s17 = smov %s795_s28  ;;  %s874_s18 = smov %s709_s19 }
 0x1ba   : > { %s875_s19 = smov %s877_s23  ;;  %17 = sbr.rel (!%p15_p4) target bundleno = 4 (0x4), region = 79 }
 0x1c1   :  { %446 = vsyncpa [#allocation3], 1 }
 0x1c2   :  { %448 = vsyncpa [#allocation3 + $0x1], 1 }

</bundles_post_ra>
